<compile_context>
chip_gen: v7x
topology: tpu7x:2x2x1
jax: 0.10.0
libtpu: 0.0.40
codegen_flags: <defaults>
</compile_context>

<pallas_src>
import functools

import jax
import jax.numpy as jnp
from jax.experimental import pallas as pl
from jax.experimental.pallas import tpu as pltpu


# ---------------------------------------------------------------------------
# Pallas kernel: stacked encoder, forward model, lane-dense MSE row sums.
# ---------------------------------------------------------------------------
def _wm_kernel(
    x_t_ref, x_tp1_ref, a_t_ref,
    ew1_ref, eb1_ref, ew2_ref, eb2_ref,              # random encoder params
    fw1z_ref, fw1a_ref, fb1_ref, fw2_ref, fb2_ref,   # forward-model params
    loss_vec_ref,
):
    tb = x_t_ref.shape[0]

    # --- Random encoder (frozen, forward-only): one matmul per layer on the
    #     stacked [2*TB, D] batch instead of two separate passes.
    x_all = jnp.concatenate([x_t_ref[...], x_tp1_ref[...]], axis=0)      # (2TB, D)
    h = jnp.dot(x_all, ew1_ref[...], preferred_element_type=jnp.float32) + eb1_ref[...]
    h = jnp.maximum(h, 0.0)
    z_all = jnp.dot(h, ew2_ref[...], preferred_element_type=jnp.float32) + eb2_ref[...]
    z_t = z_all[:tb]                                                     # (TB, Z)
    z_tp1 = z_all[tb:]                                                   # (TB, Z)

    # --- ForwardModel: cat([z_t, a_t], dim=1) @ W1 == z_t @ W1_z + a_t @ W1_a
    hf = (
        jnp.dot(z_t, fw1z_ref[...], preferred_element_type=jnp.float32)
        + jnp.dot(a_t_ref[...], fw1a_ref[...], preferred_element_type=jnp.float32)
        + fb1_ref[...]
    )
    hf = jnp.maximum(hf, 0.0)
    z_diff = jnp.dot(hf, fw2_ref[...], preferred_element_type=jnp.float32) + fb2_ref[...]

    # --- MSELoss(reduction='none')(z_t + z_diff, z_tp1).sum(dim=1),
    #     emitted lane-dense as a (1, TB) row (batch along lanes).
    diff = z_t + z_diff - z_tp1                                          # (TB, Z)
    sq = diff * diff
    ones8 = jnp.ones((8, sq.shape[1]), jnp.float32)
    # ones8 @ sq^T on the MXU: every row equals the per-example sum over Z,
    # already laid out along lanes -> no masked stores, no relayout.
    rowsum = jax.lax.dot_general(
        ones8, sq, (((1,), (1,)), ((), ())),
        preferred_element_type=jnp.float32,
    )                                                                    # (8, TB)
    loss_vec_ref[...] = rowsum[0:1, :]                                   # (1, TB)


# ---------------------------------------------------------------------------
# Spec helpers.
# ---------------------------------------------------------------------------
def _round_up(x, m):
    return (x + m - 1) // m * m


def _tiled_spec(block_shape):
    """Block indexed by the batch-grid step along axis 0."""
    n_rest = len(block_shape) - 1
    return pl.BlockSpec(block_shape, lambda i, _n=n_rest: (i,) + (0,) * _n)


def _resident_spec(shape):
    """Full-array block with a constant index -> stays VMEM-resident."""
    n = len(shape)
    return pl.BlockSpec(shape, lambda i, _n=n: (0,) * _n)


# ---------------------------------------------------------------------------
# Python wrapper: padding, pallas_call, mean over the true batch.
# ---------------------------------------------------------------------------
@functools.partial(jax.jit, static_argnames=("tile_b",))
def _run_kernel(x_t, a_t, x_tp1, params, *, tile_b=512):
    x_t = x_t.astype(jnp.float32)
    x_tp1 = x_tp1.astype(jnp.float32)
    a_t = a_t.astype(jnp.float32)

    B, D = x_t.shape
    A = a_t.shape[1]
    ew1, eb1, ew2, eb2, fw1z, fw1a, fb1, fw2, fb2 = params
    He = ew1.shape[1]
    Z = ew2.shape[1]
    H = fw1z.shape[1]

    # Batch tile: multiple of 128 so the lane-dense loss output block is
    # 128-aligned.  tile_b ~512 is comfortable for v5e/v6e VMEM budgets;
    # use ~256 on v7x (64 MiB VMEM, tiles also shard across its 2 TCs).
    TB = _round_up(min(tile_b, _round_up(B, 128)), 128)
    B_pad = _round_up(B, TB)
    pad = B_pad - B
    if pad:
        x_t = jnp.pad(x_t, ((0, pad), (0, 0)))
        x_tp1 = jnp.pad(x_tp1, ((0, pad), (0, 0)))
        a_t = jnp.pad(a_t, ((0, pad), (0, 0)))

    grid = (B_pad // TB,)
    in_specs = [
        _tiled_spec((TB, D)),      # x_t
        _tiled_spec((TB, D)),      # x_tp1
        _tiled_spec((TB, A)),      # a_t
        _resident_spec((D, He)),   # ew1
        _resident_spec((1, He)),   # eb1
        _resident_spec((He, Z)),   # ew2
        _resident_spec((1, Z)),    # eb2
        _resident_spec((Z, H)),    # fw1z
        _resident_spec((A, H)),    # fw1a
        _resident_spec((1, H)),    # fb1
        _resident_spec((H, Z)),    # fw2
        _resident_spec((1, Z)),    # fb2
    ]
    out_specs = pl.BlockSpec((1, TB), lambda i: (0, i))
    out_shape = jax.ShapeDtypeStruct((1, B_pad), jnp.float32)

    loss_vec_padded = pl.pallas_call(
        _wm_kernel,
        grid=grid,
        in_specs=in_specs,
        out_specs=out_specs,
        out_shape=out_shape,
        compiler_params=pltpu.CompilerParams(
            dimension_semantics=("parallel",),
        ),
    )(x_t, x_tp1, a_t, ew1, eb1, ew2, eb2, fw1z, fw1a, fb1, fw2, fb2)

    loss_vector = loss_vec_padded[0, :B]      # drop zero-padded tail rows
    loss = jnp.mean(loss_vector)              # mean over exactly B samples
    return loss_vector, loss


def world_model_forward(params, x_t, a_t, x_tp1, eval=False, tile_b=512):
    """Mirrors DeterministicCRandomEncodedFM.forward -> (loss_vector, loss, loss_dict)."""
    loss_vector, loss = _run_kernel(x_t, a_t, x_tp1, params, tile_b=tile_b)
    if eval:
        return loss_vector, None, None
    # Keep `wm_loss` as a device scalar: no forced device->host sync per step.
    return loss_vector, loss, {"wm_loss": loss}


# ---------------------------------------------------------------------------
# Deterministic parameter init (PyTorch nn.Linear style: U(-1/sqrt(fan_in), ..));
# weights are stored [in, out] (transpose of torch.nn.Linear.weight).
# ---------------------------------------------------------------------------
def init_params(key, D, A, Z, He, H):
    def linear(key, fan_in, fan_out):
        kw, kb = jax.random.split(key)
        bound = 1.0 / jnp.sqrt(jnp.float32(fan_in))
        w = jax.random.uniform(kw, (fan_in, fan_out), jnp.float32, -bound, bound)
        b = jax.random.uniform(kb, (1, fan_out), jnp.float32, -bound, bound)
        return w, b

    k = jax.random.split(key, 4)
    ew1, eb1 = linear(k[0], D, He)        # encoder layer 1
    ew2, eb2 = linear(k[1], He, Z)        # encoder layer 2
    fw1, fb1 = linear(k[2], Z + A, H)     # forward model layer 1 (split below)
    fw2, fb2 = linear(k[3], H, Z)         # forward model layer 2
    fw1z, fw1a = fw1[:Z], fw1[Z:]
    return (ew1, eb1, ew2, eb2, fw1z, fw1a, fb1, fw2, fb2)


def _reference(params, x_t, a_t, x_tp1):
    ew1, eb1, ew2, eb2, fw1z, fw1a, fb1, fw2, fb2 = params
    enc = lambda x: jnp.maximum(x @ ew1 + eb1, 0.0) @ ew2 + eb2
    z_t, z_tp1 = enc(x_t), enc(x_tp1)
    h = jnp.maximum(z_t @ fw1z + a_t @ fw1a + fb1, 0.0)
    z_diff = h @ fw2 + fb2
    loss_vec = jnp.sum((z_t + z_diff - z_tp1) ** 2, axis=1)
    return loss_vec, jnp.mean(loss_vec)


if __name__ == "__main__":
    # Small shapes consistent with the 1-D observation path of the module.
    # B is deliberately NOT a multiple of the tile to exercise padding,
    # and tile_b=128 forces a multi-step grid (pipelined, padded tail tile).
    B, D, A, Z, He, H = 200, 32, 4, 16, 64, 32

    key = jax.random.PRNGKey(0)
    kp, kx, ka, kxp = jax.random.split(key, 4)

    params = init_params(kp, D, A, Z, He, H)
    x_t = jax.random.normal(kx, (B, D), jnp.float32)
    x_tp1 = x_t + 0.1 * jax.random.normal(kxp, (B, D), jnp.float32)
    a_idx = jax.random.randint(ka, (B,), 0, A)
    a_t = jax.nn.one_hot(a_idx, A, dtype=jnp.float32)   # one-hot action vector

    loss_vector, loss, loss_dict = world_model_forward(
        params, x_t, a_t, x_tp1, eval=False, tile_b=128)
    jax.block_until_ready((loss_vector, loss))

    ref_vec, ref_loss = _reference(params, x_t, a_t, x_tp1)
    assert loss_vector.shape == (B,)
    assert jnp.allclose(loss_vector, ref_vec, rtol=1e-4, atol=1e-4), "loss_vector mismatch"
    assert jnp.allclose(loss, ref_loss, rtol=1e-4, atol=1e-4), "loss mismatch"
    assert jnp.allclose(loss_dict["wm_loss"], ref_loss, rtol=1e-4, atol=1e-4), "loss_dict mismatch"

    # Also exercise the eval path once.
    eval_vec, eval_loss, eval_dict = world_model_forward(
        params, x_t, a_t, x_tp1, eval=True, tile_b=128)
    jax.block_until_ready(eval_vec)
    assert eval_loss is None and eval_dict is None
    assert jnp.allclose(eval_vec, ref_vec, rtol=1e-4, atol=1e-4), "eval loss_vector mismatch"

    print("KERNEL_OK")
</pallas_src>

<mosaic_0001>
module attributes {stable_mosaic.version = 11 : i64} {
  func.func @_wm_kernel(%arg0: i32, %arg1: memref<128x32xf32, #tpu.memory_space<vmem>>, %arg2: memref<128x32xf32, #tpu.memory_space<vmem>>, %arg3: memref<128x4xf32, #tpu.memory_space<vmem>>, %arg4: memref<32x64xf32, #tpu.memory_space<vmem>>, %arg5: memref<1x64xf32, #tpu.memory_space<vmem>>, %arg6: memref<64x16xf32, #tpu.memory_space<vmem>>, %arg7: memref<1x16xf32, #tpu.memory_space<vmem>>, %arg8: memref<16x32xf32, #tpu.memory_space<vmem>>, %arg9: memref<4x32xf32, #tpu.memory_space<vmem>>, %arg10: memref<1x32xf32, #tpu.memory_space<vmem>>, %arg11: memref<32x16xf32, #tpu.memory_space<vmem>>, %arg12: memref<1x16xf32, #tpu.memory_space<vmem>>, %arg13: memref<1x128xf32, #tpu.memory_space<vmem>>) attributes {dimension_semantics = [#tpu.dimension_semantics<parallel>], iteration_bounds = array<i64: 2>, scalar_prefetch = 0 : i64, scratch_operands = 0 : i64, tpu.core_type = #tpu.core_type<tc>, window_params = [{transform_indices = @transform_0, window_bounds = array<i64: 128, 32>}, {transform_indices = @transform_1, window_bounds = array<i64: 128, 32>}, {transform_indices = @transform_2, window_bounds = array<i64: 128, 4>}, {pipeline_mode = #tpu.pipeline_mode<synchronous>, transform_indices = @transform_3, window_bounds = array<i64: 32, 64>}, {pipeline_mode = #tpu.pipeline_mode<synchronous>, transform_indices = @transform_4, window_bounds = array<i64: 1, 64>}, {pipeline_mode = #tpu.pipeline_mode<synchronous>, transform_indices = @transform_5, window_bounds = array<i64: 64, 16>}, {pipeline_mode = #tpu.pipeline_mode<synchronous>, transform_indices = @transform_6, window_bounds = array<i64: 1, 16>}, {pipeline_mode = #tpu.pipeline_mode<synchronous>, transform_indices = @transform_7, window_bounds = array<i64: 16, 32>}, {pipeline_mode = #tpu.pipeline_mode<synchronous>, transform_indices = @transform_8, window_bounds = array<i64: 4, 32>}, {pipeline_mode = #tpu.pipeline_mode<synchronous>, transform_indices = @transform_9, window_bounds = array<i64: 1, 32>}, {pipeline_mode = #tpu.pipeline_mode<synchronous>, transform_indices = @transform_10, window_bounds = array<i64: 32, 16>}, {pipeline_mode = #tpu.pipeline_mode<synchronous>, transform_indices = @transform_11, window_bounds = array<i64: 1, 16>}, {transform_indices = @transform_12, window_bounds = array<i64: 1, 128>}]} {
    %c0 = arith.constant 0 : index
    %c0_0 = arith.constant 0 : index
    %0 = vector.load %arg1[%c0, %c0_0] : memref<128x32xf32, #tpu.memory_space<vmem>>, vector<128x32xf32>
    %c0_1 = arith.constant 0 : index
    %c0_2 = arith.constant 0 : index
    %1 = vector.load %arg2[%c0_1, %c0_2] : memref<128x32xf32, #tpu.memory_space<vmem>>, vector<128x32xf32>
    %2 = tpu.concatenate %0, %1 in 0 : vector<128x32xf32>, vector<128x32xf32> -> vector<256x32xf32>
    %c0_3 = arith.constant 0 : index
    %c0_4 = arith.constant 0 : index
    %3 = vector.load %arg4[%c0_3, %c0_4] : memref<32x64xf32, #tpu.memory_space<vmem>>, vector<32x64xf32>
    %cst = arith.constant dense<0.000000e+00> : vector<256x64xf32>
    %4 = tpu.matmul %2, %3, %cst {dimension_numbers = #tpu.dot_dimension_numbers<[1], [0], [0], [1], [0, 0, 1, 1], [], []>} : vector<256x32xf32>, vector<32x64xf32>, vector<256x64xf32> -> vector<256x64xf32>
    %c0_5 = arith.constant 0 : index
    %c0_6 = arith.constant 0 : index
    %5 = vector.load %arg5[%c0_5, %c0_6] : memref<1x64xf32, #tpu.memory_space<vmem>>, vector<1x64xf32>
    %6 = vector.broadcast %5 : vector<1x64xf32> to vector<256x64xf32>
    %7 = arith.addf %4, %6 : vector<256x64xf32>
    %cst_7 = arith.constant 0.000000e+00 : f32
    %8 = vector.broadcast %cst_7 : f32 to vector<256x64xf32>
    %9 = arith.maximumf %7, %8 : vector<256x64xf32>
    %c0_8 = arith.constant 0 : index
    %c0_9 = arith.constant 0 : index
    %10 = vector.load %arg6[%c0_8, %c0_9] : memref<64x16xf32, #tpu.memory_space<vmem>>, vector<64x16xf32>
    %cst_10 = arith.constant dense<0.000000e+00> : vector<256x16xf32>
    %11 = tpu.matmul %9, %10, %cst_10 {dimension_numbers = #tpu.dot_dimension_numbers<[1], [0], [0], [1], [0, 0, 1, 1], [], []>} : vector<256x64xf32>, vector<64x16xf32>, vector<256x16xf32> -> vector<256x16xf32>
    %c0_11 = arith.constant 0 : index
    %c0_12 = arith.constant 0 : index
    %12 = vector.load %arg7[%c0_11, %c0_12] : memref<1x16xf32, #tpu.memory_space<vmem>>, vector<1x16xf32>
    %13 = vector.broadcast %12 : vector<1x16xf32> to vector<256x16xf32>
    %14 = arith.addf %11, %13 : vector<256x16xf32>
    %15 = vector.extract_strided_slice %14 {offsets = [0, 0], sizes = [128, 16], strides = [1, 1]} : vector<256x16xf32> to vector<128x16xf32>
    %16 = vector.extract_strided_slice %14 {offsets = [128, 0], sizes = [128, 16], strides = [1, 1]} : vector<256x16xf32> to vector<128x16xf32>
    %c0_13 = arith.constant 0 : index
    %c0_14 = arith.constant 0 : index
    %17 = vector.load %arg8[%c0_13, %c0_14] : memref<16x32xf32, #tpu.memory_space<vmem>>, vector<16x32xf32>
    %cst_15 = arith.constant dense<0.000000e+00> : vector<128x32xf32>
    %18 = tpu.matmul %15, %17, %cst_15 {dimension_numbers = #tpu.dot_dimension_numbers<[1], [0], [0], [1], [0, 0, 1, 1], [], []>} : vector<128x16xf32>, vector<16x32xf32>, vector<128x32xf32> -> vector<128x32xf32>
    %c0_16 = arith.constant 0 : index
    %c0_17 = arith.constant 0 : index
    %19 = vector.load %arg3[%c0_16, %c0_17] : memref<128x4xf32, #tpu.memory_space<vmem>>, vector<128x4xf32>
    %c0_18 = arith.constant 0 : index
    %c0_19 = arith.constant 0 : index
    %20 = vector.load %arg9[%c0_18, %c0_19] : memref<4x32xf32, #tpu.memory_space<vmem>>, vector<4x32xf32>
    %cst_20 = arith.constant dense<0.000000e+00> : vector<128x32xf32>
    %21 = tpu.matmul %19, %20, %cst_20 {dimension_numbers = #tpu.dot_dimension_numbers<[1], [0], [0], [1], [0, 0, 1, 1], [], []>} : vector<128x4xf32>, vector<4x32xf32>, vector<128x32xf32> -> vector<128x32xf32>
    %22 = arith.addf %18, %21 : vector<128x32xf32>
    %c0_21 = arith.constant 0 : index
    %c0_22 = arith.constant 0 : index
    %23 = vector.load %arg10[%c0_21, %c0_22] : memref<1x32xf32, #tpu.memory_space<vmem>>, vector<1x32xf32>
    %24 = vector.broadcast %23 : vector<1x32xf32> to vector<128x32xf32>
    %25 = arith.addf %22, %24 : vector<128x32xf32>
    %cst_23 = arith.constant 0.000000e+00 : f32
    %26 = vector.broadcast %cst_23 : f32 to vector<128x32xf32>
    %27 = arith.maximumf %25, %26 : vector<128x32xf32>
    %c0_24 = arith.constant 0 : index
    %c0_25 = arith.constant 0 : index
    %28 = vector.load %arg11[%c0_24, %c0_25] : memref<32x16xf32, #tpu.memory_space<vmem>>, vector<32x16xf32>
    %cst_26 = arith.constant dense<0.000000e+00> : vector<128x16xf32>
    %29 = tpu.matmul %27, %28, %cst_26 {dimension_numbers = #tpu.dot_dimension_numbers<[1], [0], [0], [1], [0, 0, 1, 1], [], []>} : vector<128x32xf32>, vector<32x16xf32>, vector<128x16xf32> -> vector<128x16xf32>
    %c0_27 = arith.constant 0 : index
    %c0_28 = arith.constant 0 : index
    %30 = vector.load %arg12[%c0_27, %c0_28] : memref<1x16xf32, #tpu.memory_space<vmem>>, vector<1x16xf32>
    %31 = vector.broadcast %30 : vector<1x16xf32> to vector<128x16xf32>
    %32 = arith.addf %29, %31 : vector<128x16xf32>
    %33 = arith.addf %15, %32 : vector<128x16xf32>
    %34 = arith.subf %33, %16 : vector<128x16xf32>
    %35 = arith.mulf %34, %34 : vector<128x16xf32>
    %cst_29 = arith.constant 1.000000e+00 : f32
    %36 = vector.broadcast %cst_29 : f32 to vector<8x16xf32>
    %cst_30 = arith.constant dense<0.000000e+00> : vector<8x128xf32>
    %37 = tpu.matmul %36, %35, %cst_30 {dimension_numbers = #tpu.dot_dimension_numbers<[1], [1], [0], [0], [0, 0, 1, 0], [], []>} : vector<8x16xf32>, vector<128x16xf32>, vector<8x128xf32> -> vector<8x128xf32>
    %38 = vector.extract_strided_slice %37 {offsets = [0, 0], sizes = [1, 128], strides = [1, 1]} : vector<8x128xf32> to vector<1x128xf32>
    %c0_31 = arith.constant 0 : index
    %c0_32 = arith.constant 0 : index
    %39 = vector.load %arg13[%c0_31, %c0_32] : memref<1x128xf32, #tpu.memory_space<vmem>>, vector<1x128xf32>
    tpu.vector_store %arg13[%c0_31, %c0_32], %38 {strides = array<i32>} : memref<1x128xf32, #tpu.memory_space<vmem>>, vector<1x128xf32>,
    return
  }
  func.func @transform_0(%arg0: i32) -> (i32, i32) {
    %c0_i32 = arith.constant 0 : i32
    %c0_i32_0 = arith.constant 0 : i32
    return %arg0, %c0_i32 : i32, i32
  }
  func.func @transform_1(%arg0: i32) -> (i32, i32) {
    %c0_i32 = arith.constant 0 : i32
    %c0_i32_0 = arith.constant 0 : i32
    return %arg0, %c0_i32 : i32, i32
  }
  func.func @transform_2(%arg0: i32) -> (i32, i32) {
    %c0_i32 = arith.constant 0 : i32
    %c0_i32_0 = arith.constant 0 : i32
    return %arg0, %c0_i32 : i32, i32
  }
  func.func @transform_3(%arg0: i32) -> (i32, i32) {
    %c0_i32 = arith.constant 0 : i32
    %c0_i32_0 = arith.constant 0 : i32
    %c0_i32_1 = arith.constant 0 : i32
    return %c0_i32, %c0_i32_0 : i32, i32
  }
  func.func @transform_4(%arg0: i32) -> (i32, i32) {
    %c0_i32 = arith.constant 0 : i32
    %c0_i32_0 = arith.constant 0 : i32
    %c0_i32_1 = arith.constant 0 : i32
    return %c0_i32, %c0_i32_0 : i32, i32
  }
  func.func @transform_5(%arg0: i32) -> (i32, i32) {
    %c0_i32 = arith.constant 0 : i32
    %c0_i32_0 = arith.constant 0 : i32
    %c0_i32_1 = arith.constant 0 : i32
    return %c0_i32, %c0_i32_0 : i32, i32
  }
  func.func @transform_6(%arg0: i32) -> (i32, i32) {
    %c0_i32 = arith.constant 0 : i32
    %c0_i32_0 = arith.constant 0 : i32
    %c0_i32_1 = arith.constant 0 : i32
    return %c0_i32, %c0_i32_0 : i32, i32
  }
  func.func @transform_7(%arg0: i32) -> (i32, i32) {
    %c0_i32 = arith.constant 0 : i32
    %c0_i32_0 = arith.constant 0 : i32
    %c0_i32_1 = arith.constant 0 : i32
    return %c0_i32, %c0_i32_0 : i32, i32
  }
  func.func @transform_8(%arg0: i32) -> (i32, i32) {
    %c0_i32 = arith.constant 0 : i32
    %c0_i32_0 = arith.constant 0 : i32
    %c0_i32_1 = arith.constant 0 : i32
    return %c0_i32, %c0_i32_0 : i32, i32
  }
  func.func @transform_9(%arg0: i32) -> (i32, i32) {
    %c0_i32 = arith.constant 0 : i32
    %c0_i32_0 = arith.constant 0 : i32
    %c0_i32_1 = arith.constant 0 : i32
    return %c0_i32, %c0_i32_0 : i32, i32
  }
  func.func @transform_10(%arg0: i32) -> (i32, i32) {
    %c0_i32 = arith.constant 0 : i32
    %c0_i32_0 = arith.constant 0 : i32
    %c0_i32_1 = arith.constant 0 : i32
    return %c0_i32, %c0_i32_0 : i32, i32
  }
  func.func @transform_11(%arg0: i32) -> (i32, i32) {
    %c0_i32 = arith.constant 0 : i32
    %c0_i32_0 = arith.constant 0 : i32
    %c0_i32_1 = arith.constant 0 : i32
    return %c0_i32, %c0_i32_0 : i32, i32
  }
  func.func @transform_12(%arg0: i32) -> (i32, i32) {
    %c0_i32 = arith.constant 0 : i32
    %c0_i32_0 = arith.constant 0 : i32
    return %c0_i32, %arg0 : i32, i32
  }
}

</mosaic_0001>

<bundles_post_ra>
// kernel: _run_kernel.1
= control target key start
LH: loop header
LB: loop body
LE: loop exit
PB: predicated region body
PF: predicated region fallthrough
CT: control target
= control target key end

     0   :  { %s2802_s21 = smov 0   ;;  %s3301_s0 = inlined_call_operand.vmem [shape: f32[256,32], index: 0, kind: input, shape index: {}]   ;;  %s3302_s1 = inlined_call_operand.vmem [shape: f32[256,32], index: 1, kind: input, shape index: {}]   ;;  %s3303_s2 = inlined_call_operand.vmem [shape: f32[256,4], index: 2, kind: input, shape index: {}]   ;;  %s3304_s3 = inlined_call_operand.vmem [shape: f32[32,64], index: 3, kind: input, shape index: {}]   ;;  %s3305_s4 = inlined_call_operand.vmem [shape: f32[1,64], index: 4, kind: input, shape index: {}]   ;;  %s3306_s5 = inlined_call_operand.vmem [shape: f32[64,16], index: 5, kind: input, shape index: {}]   ;;  %s3307_s6 = inlined_call_operand.vmem [shape: f32[1,16], index: 6, kind: input, shape index: {}]   ;;  %s3308_s7 = inlined_call_operand.vmem [shape: f32[16,32], index: 7, kind: input, shape index: {}]   ;;  %s3309_s8 = inlined_call_operand.vmem [shape: f32[4,32], index: 8, kind: input, shape index: {}]   ;;  %s3310_s9 = inlined_call_operand.vmem [shape: f32[1,32], index: 9, kind: input, shape index: {}]   ;;  %s3311_s10 = inlined_call_operand.vmem [shape: f32[32,16], index: 10, kind: input, shape index: {}]   ;;  %s3312_s11 = inlined_call_operand.vmem [shape: f32[1,16], index: 11, kind: input, shape index: {}]   ;;  %s3313_s12 = inlined_call_operand.vmem [shape: f32[1,256], index: 12, kind: output, shape index: {}]  }
   0x1 LB: > { %s2808_s22 = sadd.s32 4294967295, %s2731_s21   ;;  %p2089_p0 = scmp.ge.s32.totalorder %s2731_s21, 1  ;;  %s2731_s21 = sphi %s2802_s21, %s22_s21  }
   0x2   : > { %p385_p1 = scmp.lt.s32.totalorder %s2731_s21, 3 }
   0x4   : > { %p386_p2 = pnand %p2089_p0, %p385_p1 }
   0x5   : > { %v488_v0 = vld [vmem:[%s3304_s3] sm:$0xff] (!%p386_p2)  ;;  %v489_v1 = vld [vmem:[%s3304_s3 + $0x8] sm:$0xff] (!%p386_p2)  ;;  %v490_v2 = vld [vmem:[%s3304_s3 + $0x10] sm:$0xff] (!%p386_p2)  ;;  %s2090_s29 = sshll.u32 (!%p386_p2), %s2808_s22, 4  ;;  %vm499_vm0 = vcmask (!%p386_p2), 261120   ;;  %vm1258_vm1 = vcmask (!%p386_p2), 1043456  }
   0x6   : > { %389 = sbr.rel (%p386_p2) target bundleno = 1169 (0x491), region = 68  ;;  %v2621_v3 = vpack.c.bf16 (!%p386_p2), %v489_v1, %v488_v0  ;;  %v491_v4 = vld [vmem:[%s3304_s3 + $0x18] sm:$0xff] (!%p386_p2)  ;;  %p436_p3 = scmp.lt.s32.totalorder (!%p386_p2), %s2090_s29, 31  ;;  %v853_v5 = vld [vmem:[%s3306_s5] sm:$0xff] (!%p386_p2)  ;;  %v854_v6 = vld [vmem:[%s3306_s5 + $0x8] sm:$0xff] (!%p386_p2)  ;;  %vm868_vm2 = vcmask (!%p386_p2), 523264  }
   0x7   : > { %v2625_v7 = vpack.c.bf16 (!%p386_p2), %v491_v4, %v490_v2  ;;  %v2629_v8 = vpack.c.bf16 (!%p386_p2), %v854_v6, %v853_v5  ;;  %v855_v9 = vld [vmem:[%s3306_s5 + $0x10] sm:$0xff] (!%p386_p2)  ;;  %v856_v10 = vld [vmem:[%s3306_s5 + $0x18] sm:$0xff] (!%p386_p2)  ;;  %v857_v12 = vld [vmem:[%s3306_s5 + $0x20] sm:$0xff] (!%p386_p2)  ;;  %vm1209_vm3 = vcmask (!%p386_p2), 31744   ;;  %vm1407_vm4 = vcmask (!%p386_p2), 130048   ;;  %p453_p4 = scmp.lt.s32.totalorder (!%p386_p2), %s2808_s22, 1 }
   0x8   : > { %2622 = vmatprep.subr.bf16.mxu0 (!%p386_p2), %v2621_v3  ;;  %v2633_v11 = vpack.c.bf16 (!%p386_p2), %v856_v10, %v855_v9  ;;  %v858_v13 = vld [vmem:[%s3306_s5 + $0x28] sm:$0xff] (!%p386_p2)  ;;  %v859_v18 = vld [vmem:[%s3306_s5 + $0x30] sm:$0xff] (!%p386_p2)  ;;  %v860_v19 = vld [vmem:[%s3306_s5 + $0x38] sm:$0xff] (!%p386_p2)  ;;  %vm2734_vm5 = vmmov (!%p386_p2), 0  }
   0x9   : > { %2624 = vmatpush3.bf16.msra.mxu0 (!%p386_p2), %v2621_v3  ;;  %2689 = vmatprep.subr.bf16.mxu1 (!%p386_p2), %v2629_v8  ;;  %v2637_v16 = vpack.c.bf16 (!%p386_p2), %v858_v13, %v857_v12  ;;  %v2641_v21 = vpack.c.bf16 (!%p386_p2), %v860_v19, %v859_v18  ;;  %v1208_v50 = vld [vmem:[%s3309_s8] sm:$0xf] (!%p386_p2)  ;;  %v1191_v57 = vld [vmem:[%s3308_s7 + $0x8] sm:$0xff] (!%p386_p2)  ;;  %vm3218_vm6 = vmpackc.low (!%p386_p2), %vm1407_vm4, %vm1407_vm4 }
   0xa   : > { %2626 = vmatprep.subr.bf16.mxu0 (!%p386_p2), %v2625_v7  ;;  %2693 = vmatpush3.bf16.msra.mxu1 (!%p386_p2), %v2629_v8  ;;  %v2934_v51 = vld [vmem:[%s3305_s4] ss:$0 sm:$0xff] (!%p386_p2) }
   0xb   : > { %2690 = vmatprep.subr.bf16.mxu1 (!%p386_p2), %v2633_v11  ;;  %v1190_v56 = vld [vmem:[%s3308_s7] sm:$0xff] (!%p386_p2) }
   0xc   : > { %v2645_v0 = vpack.c.bf16 (!%p386_p2), %v1191_v57, %v1190_v56 }
   0xd   : > { %s3317_s29 = smov (!%p436_p3, %s2090_s29), 31  ;;  %2628 = vmatpush3.bf16.msra.mxu0 %v2625_v7  ;;  %s3319_s22 = smov (!%p453_p4, %s2808_s22), 1 }
   0xe   : > { %s2837_s24 = sshll.u32 %s3317_s29, 3  ;;  %2630 = vmatprep.subr.bf16.mxu0 %v2629_v8  ;;  %2694 = vmatpush3.bf16.msra.mxu1 %v2633_v11 }
   0xf   : > { %s2849_s14 = scalar_lea.vmem %s3301_s0, %s2837_s24  ;;  %2691 = vmatprep.subr.bf16.mxu1 %v2637_v16  ;;  %s2889_s20 = scalar_lea.vmem %s3302_s1, %s2837_s24 }
  0x10   : > { %v456_v14 = vld [vmem:[%s2849_s14] sm:$0xff]  ;;  %v457_v15 = vld [vmem:[%s2849_s14 + $0x8] sm:$0xff]  ;;  %v458_v17 = vld [vmem:[%s2849_s14 + $0x10] sm:$0xff]  ;;  %s2942_s13 = scalar_lea.vmem %s3303_s2, %s2837_s24  ;;  %s455_s24 = scalar_lea.vmem %s3313_s12, %s3319_s22 }
  0x11   : > { %2388 = vmatprep.mubr.msk.f32.mxu0 %vm499_vm0, %v456_v14  ;;  %v459_v20 = vld [vmem:[%s2849_s14 + $0x18] sm:$0xff]  ;;  %v460_v22 = vld [vmem:[%s2849_s14 + $0x20] sm:$0xff]  ;;  %v461_v23 = vld [vmem:[%s2849_s14 + $0x28] sm:$0xff] }
  0x12   : > { %2389 = vmatmul.mubr.msk.f32.vlgmr.msra.gmra.mrb[0].mxu0 %vm499_vm0, %v457_v15  ;;  %2695 = vmatpush3.bf16.msra.mxu1 %v2637_v16  ;;  %v462_v24 = vld [vmem:[%s2849_s14 + $0x30] sm:$0xff]  ;;  %v463_v25 = vld [vmem:[%s2849_s14 + $0x38] sm:$0xff]  ;;  %v464_v26 = vld [vmem:[%s2849_s14 + $0x40] sm:$0xff] }
  0x13   : > { %2391 = vmatprep.mubr.msk.f32.mxu0 %vm499_vm0, %v458_v17  ;;  %2632 = vmatpush3.bf16.msra.mxu0 %v2629_v8  ;;  %v465_v27 = vld [vmem:[%s2849_s14 + $0x48] sm:$0xff]  ;;  %v466_v28 = vld [vmem:[%s2849_s14 + $0x50] sm:$0xff]  ;;  %v467_v29 = vld [vmem:[%s2849_s14 + $0x58] sm:$0xff] }
  0x14   : > { %2634 = vmatprep.subr.bf16.mxu0 %v2633_v11  ;;  %2692 = vmatprep.subr.bf16.mxu1 %v2641_v21  ;;  %v468_v30 = vld [vmem:[%s2849_s14 + $0x60] sm:$0xff]  ;;  %v469_v31 = vld [vmem:[%s2849_s14 + $0x68] sm:$0xff]  ;;  %v470_v32 = vld [vmem:[%s2849_s14 + $0x70] sm:$0xff] }
  0x15   : > { %v471_v33 = vld [vmem:[%s2849_s14 + $0x78] sm:$0xff]  ;;  %v472_v34 = vld [vmem:[%s2889_s20] sm:$0xff]  ;;  %v473_v35 = vld [vmem:[%s2889_s20 + $0x8] sm:$0xff] }
  0x16   : > { %2392 = vmatmul.mubr.msk.f32.gmra.mrb[2].mxu0 %vm499_vm0, %v459_v20  ;;  %2696 = vmatpush3.bf16.msra.mxu1 %v2641_v21  ;;  %v474_v36 = vld [vmem:[%s2889_s20 + $0x10] sm:$0xff]  ;;  %v475_v37 = vld [vmem:[%s2889_s20 + $0x18] sm:$0xff]  ;;  %v476_v38 = vld [vmem:[%s2889_s20 + $0x20] sm:$0xff] }
  0x17   : > { %2394 = vmatprep.mubr.msk.f32.mxu0 %vm499_vm0, %v460_v22  ;;  %2636 = vmatpush3.bf16.msra.mxu0 %v2633_v11  ;;  %v477_v39 = vld [vmem:[%s2889_s20 + $0x28] sm:$0xff]  ;;  %v478_v40 = vld [vmem:[%s2889_s20 + $0x30] sm:$0xff]  ;;  %v479_v41 = vld [vmem:[%s2889_s20 + $0x38] sm:$0xff] }
  0x18   : > { %2638 = vmatprep.subr.bf16.mxu0 %v2637_v16  ;;  %v480_v42 = vld [vmem:[%s2889_s20 + $0x40] sm:$0xff]  ;;  %v481_v43 = vld [vmem:[%s2889_s20 + $0x48] sm:$0xff]  ;;  %v482_v44 = vld [vmem:[%s2889_s20 + $0x50] sm:$0xff] }
  0x19   : > { %v483_v45 = vld [vmem:[%s2889_s20 + $0x58] sm:$0xff]  ;;  %v484_v46 = vld [vmem:[%s2889_s20 + $0x60] sm:$0xff]  ;;  %v485_v47 = vld [vmem:[%s2889_s20 + $0x68] sm:$0xff] }
  0x1a   : > { %2395 = vmatmul.mubr.msk.f32.gmra.mrb[4].mxu0 %vm499_vm0, %v461_v23  ;;  %v486_v48 = vld [vmem:[%s2889_s20 + $0x70] sm:$0xff]  ;;  %v487_v49 = vld [vmem:[%s2889_s20 + $0x78] sm:$0xff]  ;;  %v1192_v63 = vld [vmem:[%s2942_s13] sm:$0xff] }
  0x1b   : > { %2397 = vmatprep.mubr.msk.f32.mxu0 %vm499_vm0, %v462_v24  ;;  %2640 = vmatpush3.bf16.msra.mxu0 %v2637_v16  ;;  %v1193_v5 = vld [vmem:[%s2942_s13 + $0x8] sm:$0xff]  ;;  %v1194_v8 = vld [vmem:[%s2942_s13 + $0x10] sm:$0xff]  ;;  %v1195_v13 = vld [vmem:[%s2942_s13 + $0x18] sm:$0xff] }
  0x1c   : > { %2642 = vmatprep.subr.bf16.mxu0 %v2641_v21  ;;  %v1196_v16 = vld [vmem:[%s2942_s13 + $0x20] sm:$0xff]  ;;  %v1198_v24 = vld [vmem:[%s2942_s13 + $0x30] sm:$0xff] }
  0x1e   : > { %2398 = vmatmul.mubr.msk.f32.gmra.mrb[6].mxu0 %vm499_vm0, %v463_v25 }
  0x1f   : > { %2400 = vmatprep.mubr.msk.f32.mxu0 %vm499_vm0, %v464_v26  ;;  %2644 = vmatpush3.bf16.msra.mxu0 %v2641_v21  ;;  %v1197_v21 = vld [vmem:[%s2942_s13 + $0x28] sm:$0xff] }
  0x20   : > { %2500 = vmatprep.subr.msk.mxu0 %vm1258_vm1, %v1208_v50 }
  0x22   : > { %2401 = vmatmul.mubr.msk.f32.gmra.mrb[8].mxu0 %vm499_vm0, %v465_v27 }
  0x23   : > { %2403 = vmatprep.mubr.msk.f32.mxu0 %vm499_vm0, %v466_v28 }
  0x26   : > { %2404 = vmatmul.mubr.msk.f32.gmra.mrb[10].mxu0 %vm499_vm0, %v467_v29  ;;  %v1199_v29 = vld [vmem:[%s2942_s13 + $0x38] sm:$0xff] }
  0x27   : > { %2406 = vmatprep.mubr.msk.f32.mxu0 %vm499_vm0, %v468_v30 }
  0x2a   : > { %2407 = vmatmul.mubr.msk.f32.gmra.mrb[12].mxu0 %vm499_vm0, %v469_v31 }
  0x2b   : > { %2409 = vmatprep.mubr.msk.f32.mxu0 %vm499_vm0, %v470_v32  ;;  %v1200_v32 = vld [vmem:[%s2942_s13 + $0x40] sm:$0xff] }
  0x2e   : > { %2410 = vmatmul.mubr.msk.f32.gmra.mrb[14].mxu0 %vm499_vm0, %v471_v33 }
  0x2f   : > { %2412 = vmatprep.mubr.msk.f32.mxu0 %vm499_vm0, %v472_v34 }
  0x32   : > { %2413 = vmatmul.mubr.msk.f32.gmra.mrb[16].mxu0 %vm499_vm0, %v473_v35 }
  0x33   : > { %2415 = vmatprep.mubr.msk.f32.mxu0 %vm499_vm0, %v474_v36 }
  0x36   : > { %2416 = vmatmul.mubr.msk.f32.gmra.mrb[18].mxu0 %vm499_vm0, %v475_v37  ;;  %v1201_v37 = vld [vmem:[%s2942_s13 + $0x48] sm:$0xff] }
  0x37   : > { %2418 = vmatprep.mubr.msk.f32.mxu0 %vm499_vm0, %v476_v38 }
  0x3a   : > { %2419 = vmatmul.mubr.msk.f32.gmra.mrb[20].mxu0 %vm499_vm0, %v477_v39 }
  0x3b   : > { %2421 = vmatprep.mubr.msk.f32.mxu0 %vm499_vm0, %v478_v40  ;;  %v1202_v40 = vld [vmem:[%s2942_s13 + $0x50] sm:$0xff] }
  0x3e   : > { %2422 = vmatmul.mubr.msk.f32.gmra.mrb[22].mxu0 %vm499_vm0, %v479_v41 }
  0x3f   : > { %2424 = vmatprep.mubr.msk.f32.mxu0 %vm499_vm0, %v480_v42 }
  0x42   : > { %2425 = vmatmul.mubr.msk.f32.gmra.mrb[24].mxu0 %vm499_vm0, %v481_v43 }
  0x43   : > { %2427 = vmatprep.mubr.msk.f32.mxu0 %vm499_vm0, %v482_v44 }
  0x46   : > { %2428 = vmatmul.mubr.msk.f32.gmra.mrb[26].mxu0 %vm499_vm0, %v483_v45  ;;  %v1203_v45 = vld [vmem:[%s2942_s13 + $0x58] sm:$0xff] }
  0x47   : > { %2430 = vmatprep.mubr.msk.f32.mxu0 %vm499_vm0, %v484_v46 }
  0x4a   : > { %2431 = vmatmul.mubr.msk.f32.gmra.mrb[28].mxu0 %vm499_vm0, %v485_v47 }
  0x4b   : > { %2433 = vmatprep.mubr.msk.f32.mxu0 %vm499_vm0, %v486_v48  ;;  %v1204_v48 = vld [vmem:[%s2942_s13 + $0x60] sm:$0xff] }
  0x4e   : > { %2434 = vmatmul.mubr.msk.f32.gmra.mrb[30].mxu0 %vm499_vm0, %v487_v49 }
  0xe5   : > { %v2390_v52 = vpop.f32.mrb[0].mxu0 }
  0xe6   : > { %v668_v53 = vadd.f32 %v2390_v52, %v2934_v51  ;;  %v662_v54 = vpop.f32.mrb[1].mxu0 }
  0xe7   : > { %v663_v55 = vadd.f32 %v2934_v51, %v662_v54  ;;  %v1205_v54 = vld [vmem:[%s2942_s13 + $0x68] sm:$0xff] }
  0xe8   : > { %v822_v60 = vmax.f32 %v668_v53, 0.0 }
  0xe9   : > { %v821_v58 = vmax.f32 %v663_v55, 0.0  ;;  %v2393_v59 = vpop.f32.mrb[2].mxu0 }
  0xea   : > { %v678_v61 = vadd.f32 %v2393_v59, %v2934_v51  ;;  %v672_v62 = vpop.f32.mrb[3].mxu0 }
  0xeb   : > { %v673_v1 = vadd.f32 %v2934_v51, %v672_v62  ;;  %2452 = vmatprep.mubr.msk.f32.mxu0 %vm868_vm2, %v821_v58 }
  0xec   : > { %v824_v2 = vmax.f32 %v678_v61, 0.0  ;;  %2453 = vmatmul.mubr.msk.f32.vlgmr.msra.gmra.mrb[32].mxu0 %vm868_vm2, %v822_v60 }
  0xed   : > { %v823_v3 = vmax.f32 %v673_v1, 0.0  ;;  %v2396_v4 = vpop.f32.mrb[4].mxu0  ;;  %2501 = vmatpush3.msk.msra.mxu0 %vm1258_vm1, %v1208_v50  ;;  %2502 = vmatprep.mubr.msk.f32.mxu0 %vm1209_vm3, %v1192_v63 }
  0xee   : > { %v688_v6 = vadd.f32 %v2396_v4, %v2934_v51  ;;  %v682_v7 = vpop.f32.mrb[5].mxu0  ;;  %2646 = vmatprep.subr.bf16.mxu0 %v2645_v0 }
  0xef   : > { %v683_v9 = vadd.f32 %v2934_v51, %v682_v7  ;;  %2455 = vmatprep.mubr.msk.f32.mxu1 %vm868_vm2, %v823_v3 }
  0xf0   : > { %v826_v10 = vmax.f32 %v688_v6, 0.0  ;;  %2456 = vmatmul.mubr.msk.f32.vlgmr.msra.gmra.mrb[0].mxu1 %vm868_vm2, %v824_v2  ;;  %2503 = vmatmul.mubr.msk.f32.vlgmr.msra.gmra.mrb[34].mxu0 %vm1209_vm3, %v1193_v5 }
  0xf1   : > { %v825_v11 = vmax.f32 %v683_v9, 0.0  ;;  %v2399_v12 = vpop.f32.mrb[6].mxu0  ;;  %2648 = vmatpush3.bf16.msra.mxu0 %v2645_v0  ;;  %2505 = vmatprep.mubr.msk.f32.mxu0 %vm1209_vm3, %v1194_v8 }
  0xf2   : > { %v698_v14 = vadd.f32 %v2399_v12, %v2934_v51  ;;  %v692_v15 = vpop.f32.mrb[7].mxu0 }
  0xf3   : > { %v693_v17 = vadd.f32 %v2934_v51, %v692_v15  ;;  %2458 = vmatprep.mubr.msk.f32.mxu1 %vm868_vm2, %v825_v11 }
  0xf4   : > { %v828_v18 = vmax.f32 %v698_v14, 0.0  ;;  %2459 = vmatmul.mubr.msk.f32.gmra.mrb[2].mxu1 %vm868_vm2, %v826_v10  ;;  %2506 = vmatmul.mubr.msk.f32.gmra.mrb[36].mxu0 %vm1209_vm3, %v1195_v13 }
  0xf5   : > { %v827_v19 = vmax.f32 %v693_v17, 0.0  ;;  %v2402_v20 = vpop.f32.mrb[8].mxu0  ;;  %2508 = vmatprep.mubr.msk.f32.mxu0 %vm1209_vm3, %v1196_v16 }
  0xf6   : > { %v708_v22 = vadd.f32 %v2402_v20, %v2934_v51  ;;  %v702_v23 = vpop.f32.mrb[9].mxu0 }
  0xf7   : > { %v703_v25 = vadd.f32 %v2934_v51, %v702_v23  ;;  %2461 = vmatprep.mubr.msk.f32.mxu1 %vm868_vm2, %v827_v19 }
  0xf8   : > { %v830_v26 = vmax.f32 %v708_v22, 0.0  ;;  %2462 = vmatmul.mubr.msk.f32.gmra.mrb[4].mxu1 %vm868_vm2, %v828_v18  ;;  %2509 = vmatmul.mubr.msk.f32.gmra.mrb[38].mxu0 %vm1209_vm3, %v1197_v21 }
  0xf9   : > { %v829_v27 = vmax.f32 %v703_v25, 0.0  ;;  %v2405_v28 = vpop.f32.mrb[10].mxu0  ;;  %2511 = vmatprep.mubr.msk.f32.mxu0 %vm1209_vm3, %v1198_v24 }
  0xfa   : > { %v718_v30 = vadd.f32 %v2405_v28, %v2934_v51  ;;  %v712_v31 = vpop.f32.mrb[11].mxu0 }
  0xfb   : > { %v713_v33 = vadd.f32 %v2934_v51, %v712_v31  ;;  %2464 = vmatprep.mubr.msk.f32.mxu1 %vm868_vm2, %v829_v27 }
  0xfc   : > { %v832_v34 = vmax.f32 %v718_v30, 0.0  ;;  %2465 = vmatmul.mubr.msk.f32.gmra.mrb[6].mxu1 %vm868_vm2, %v830_v26  ;;  %2512 = vmatmul.mubr.msk.f32.gmra.mrb[40].mxu0 %vm1209_vm3, %v1199_v29 }
  0xfd   : > { %v831_v35 = vmax.f32 %v713_v33, 0.0  ;;  %v2408_v36 = vpop.f32.mrb[12].mxu0  ;;  %2514 = vmatprep.mubr.msk.f32.mxu0 %vm1209_vm3, %v1200_v32 }
  0xfe   : > { %v728_v38 = vadd.f32 %v2408_v36, %v2934_v51  ;;  %v722_v39 = vpop.f32.mrb[13].mxu0 }
  0xff   : > { %v723_v41 = vadd.f32 %v2934_v51, %v722_v39  ;;  %2467 = vmatprep.mubr.msk.f32.mxu1 %vm868_vm2, %v831_v35  ;;  %v1207_v39 = vld [vmem:[%s2942_s13 + $0x78] sm:$0xff] }
 0x100   : > { %v834_v42 = vmax.f32 %v728_v38, 0.0  ;;  %2468 = vmatmul.mubr.msk.f32.gmra.mrb[8].mxu1 %vm868_vm2, %v832_v34  ;;  %2515 = vmatmul.mubr.msk.f32.gmra.mrb[42].mxu0 %vm1209_vm3, %v1201_v37  ;;  %v1206_v38 = vld [vmem:[%s2942_s13 + $0x70] sm:$0xff] }
 0x101   : > { %v833_v43 = vmax.f32 %v723_v41, 0.0  ;;  %v2411_v44 = vpop.f32.mrb[14].mxu0  ;;  %2517 = vmatprep.mubr.msk.f32.mxu0 %vm1209_vm3, %v1202_v40  ;;  %v1640_v40 = vld [vmem:[%s3311_s10] sm:$0xff] }
 0x102   : > { %v738_v46 = vadd.f32 %v2411_v44, %v2934_v51  ;;  %v732_v47 = vpop.f32.mrb[15].mxu0 }
 0x103   : > { %v733_v49 = vadd.f32 %v2934_v51, %v732_v47  ;;  %2470 = vmatprep.mubr.msk.f32.mxu1 %vm868_vm2, %v833_v43  ;;  %v1643_v43 = vld [vmem:[%s3311_s10 + $0x18] sm:$0xff] }
 0x104   : > { %v836_v50 = vmax.f32 %v738_v46, 0.0  ;;  %2471 = vmatmul.mubr.msk.f32.gmra.mrb[10].mxu1 %vm868_vm2, %v834_v42  ;;  %2518 = vmatmul.mubr.msk.f32.gmra.mrb[44].mxu0 %vm1209_vm3, %v1203_v45  ;;  %v1642_v42 = vld [vmem:[%s3311_s10 + $0x10] sm:$0xff]  ;;  %v3060_v45 = vld [vmem:[%s3307_s6] ss:$0 sm:$0xff] }
 0x105   : > { %v835_v52 = vmax.f32 %v733_v49, 0.0  ;;  %v2414_v53 = vpop.f32.mrb[16].mxu0  ;;  %2520 = vmatprep.mubr.msk.f32.mxu0 %vm1209_vm3, %v1204_v48  ;;  %v2653_v44 = vpack.c.bf16 %v1643_v43, %v1642_v42 }
 0x106   : > { %v748_v55 = vadd.f32 %v2414_v53, %v2934_v51  ;;  %v742_v56 = vpop.f32.mrb[17].mxu0 }
 0x107   : > { %2473 = vmatprep.mubr.msk.f32.mxu1 %vm868_vm2, %v835_v52  ;;  %v743_v57 = vadd.f32 %v2934_v51, %v742_v56 }
 0x108   : > { %2474 = vmatmul.mubr.msk.f32.gmra.mrb[12].mxu1 %vm868_vm2, %v836_v50  ;;  %v838_v58 = vmax.f32 %v748_v55, 0.0  ;;  %2521 = vmatmul.mubr.msk.f32.gmra.mrb[46].mxu0 %vm1209_vm3, %v1205_v54 }
 0x109   : > { %v837_v59 = vmax.f32 %v743_v57, 0.0  ;;  %v2417_v60 = vpop.f32.mrb[18].mxu0  ;;  %2523 = vmatprep.mubr.msk.f32.mxu0 %vm1209_vm3, %v1206_v38 }
 0x10a   : > { %v758_v61 = vadd.f32 %v2417_v60, %v2934_v51  ;;  %v752_v62 = vpop.f32.mrb[19].mxu0 }
 0x10b   : > { %v753_v63 = vadd.f32 %v2934_v51, %v752_v62  ;;  %2476 = vmatprep.mubr.msk.f32.mxu1 %vm868_vm2, %v837_v59 }
 0x10c   : > { %v840_v0 = vmax.f32 %v758_v61, 0.0  ;;  %2477 = vmatmul.mubr.msk.f32.gmra.mrb[14].mxu1 %vm868_vm2, %v838_v58  ;;  %2524 = vmatmul.mubr.msk.f32.gmra.mrb[48].mxu0 %vm1209_vm3, %v1207_v39 }
 0x10d   : > { %v839_v1 = vmax.f32 %v753_v63, 0.0  ;;  %v2420_v2 = vpop.f32.mrb[20].mxu0 }
 0x10e   : > { %v768_v3 = vadd.f32 %v2420_v2, %v2934_v51  ;;  %v762_v4 = vpop.f32.mrb[21].mxu0 }
 0x10f   : > { %v763_v5 = vadd.f32 %v2934_v51, %v762_v4  ;;  %2479 = vmatprep.mubr.msk.f32.mxu1 %vm868_vm2, %v839_v1 }
 0x110   : > { %v842_v6 = vmax.f32 %v768_v3, 0.0  ;;  %2480 = vmatmul.mubr.msk.f32.gmra.mrb[16].mxu1 %vm868_vm2, %v840_v0 }
 0x111   : > { %v841_v7 = vmax.f32 %v763_v5, 0.0  ;;  %v2423_v8 = vpop.f32.mrb[22].mxu0 }
 0x112   : > { %v778_v9 = vadd.f32 %v2423_v8, %v2934_v51  ;;  %v772_v10 = vpop.f32.mrb[23].mxu0 }
 0x113   : > { %v773_v11 = vadd.f32 %v2934_v51, %v772_v10  ;;  %2482 = vmatprep.mubr.msk.f32.mxu1 %vm868_vm2, %v841_v7 }
 0x114   : > { %v844_v12 = vmax.f32 %v778_v9, 0.0  ;;  %2483 = vmatmul.mubr.msk.f32.gmra.mrb[18].mxu1 %vm868_vm2, %v842_v6 }
 0x115   : > { %v843_v13 = vmax.f32 %v773_v11, 0.0  ;;  %v2426_v14 = vpop.f32.mrb[24].mxu0 }
 0x116   : > { %v788_v15 = vadd.f32 %v2426_v14, %v2934_v51  ;;  %v782_v16 = vpop.f32.mrb[25].mxu0 }
 0x117   : > { %v783_v17 = vadd.f32 %v2934_v51, %v782_v16  ;;  %2485 = vmatprep.mubr.msk.f32.mxu1 %vm868_vm2, %v843_v13 }
 0x118   : > { %v846_v18 = vmax.f32 %v788_v15, 0.0  ;;  %2486 = vmatmul.mubr.msk.f32.gmra.mrb[20].mxu1 %vm868_vm2, %v844_v12 }
 0x119   : > { %v845_v19 = vmax.f32 %v783_v17, 0.0  ;;  %v2429_v20 = vpop.f32.mrb[26].mxu0 }
 0x11a   : > { %v798_v21 = vadd.f32 %v2429_v20, %v2934_v51  ;;  %v792_v22 = vpop.f32.mrb[27].mxu0 }
 0x11b   : > { %v793_v23 = vadd.f32 %v2934_v51, %v792_v22  ;;  %2488 = vmatprep.mubr.msk.f32.mxu1 %vm868_vm2, %v845_v19 }
 0x11c   : > { %v848_v24 = vmax.f32 %v798_v21, 0.0  ;;  %2489 = vmatmul.mubr.msk.f32.gmra.mrb[22].mxu1 %vm868_vm2, %v846_v18 }
 0x11d   : > { %v847_v25 = vmax.f32 %v793_v23, 0.0  ;;  %v2432_v26 = vpop.f32.mrb[28].mxu0 }
 0x11e   : > { %v808_v27 = vadd.f32 %v2432_v26, %v2934_v51  ;;  %v802_v28 = vpop.f32.mrb[29].mxu0 }
 0x11f   : > { %v803_v29 = vadd.f32 %v2934_v51, %v802_v28  ;;  %2491 = vmatprep.mubr.msk.f32.mxu1 %vm868_vm2, %v847_v25 }
 0x120   : > { %v850_v30 = vmax.f32 %v808_v27, 0.0  ;;  %2492 = vmatmul.mubr.msk.f32.gmra.mrb[24].mxu1 %vm868_vm2, %v848_v24 }
 0x121   : > { %v849_v31 = vmax.f32 %v803_v29, 0.0  ;;  %v2435_v32 = vpop.f32.mrb[30].mxu0 }
 0x122   : > { %v818_v33 = vadd.f32 %v2435_v32, %v2934_v51  ;;  %v812_v34 = vpop.f32.mrb[31].mxu0 }
 0x123   : > { %2494 = vmatprep.mubr.msk.f32.mxu1 %vm868_vm2, %v849_v31  ;;  %v813_v35 = vadd.f32 %v2934_v51, %v812_v34  ;;  %v1641_v51 = vld [vmem:[%s3311_s10 + $0x8] sm:$0xff]  ;;  %v2195_v31 = vld [vmem:[%s3310_s9] ss:$0 sm:$0xff] }
 0x124   : > { %2495 = vmatmul.mubr.msk.f32.gmra.mrb[26].mxu1 %vm868_vm2, %v850_v30  ;;  %v852_v36 = vmax.f32 %v818_v33, 0.0  ;;  %v2649_v41 = vpack.c.bf16 %v1641_v51, %v1640_v40 }
 0x125   : > { %v851_v37 = vmax.f32 %v813_v35, 0.0 }
 0x126   : > { %2650 = vmatprep.subr.bf16.mxu1 %v2649_v41 }
 0x127   : > { %2497 = vmatprep.mubr.msk.f32.mxu1 %vm868_vm2, %v851_v37  ;;  %2652 = vmatpush3.bf16.msra.mxu1 %v2649_v41 }
 0x128   : > { %2498 = vmatmul.mubr.msk.f32.gmra.mrb[28].mxu1 %vm868_vm2, %v852_v36  ;;  %2654 = vmatprep.subr.bf16.mxu1 %v2653_v44 }
 0x12b   : > { %2656 = vmatpush3.bf16.msra.mxu1 %v2653_v44 }
 0x1bf   : > { %v2454_v46 = vpop.f32.mrb[32].mxu0 }
 0x1c0   : > { %v1031_v47 = vpop.f32.mrb[33].mxu0  ;;  %v3066_v49 = vadd.f32 %v2454_v46, %v3060_v45 }
 0x1c1   : > { %v3063_v48 = vadd.f32 %v3060_v45, %v1031_v47 }
 0x1c3   : > { %v2457_v50 = vpop.f32.mrb[0].mxu1  ;;  %2530 = vmatprep.mubr.msk.f32.mxu0 %vm1407_vm4, %v3063_v48 }
 0x1c4   : > { %v3071_v52 = vadd.f32 %v2457_v50, %v3060_v45  ;;  %v1041_v53 = vpop.f32.mrb[1].mxu1  ;;  %2531 = vmatmul.mubr.msk.f32.vlgmr.msra.gmra.mrb[34].mxu0 %vm1407_vm4, %v3066_v49 }
 0x1c5   : > { %v3076_v54 = vadd.f32 %v3060_v45, %v1041_v53 }
 0x1c7   : > { %v2460_v55 = vpop.f32.mrb[2].mxu1  ;;  %2533 = vmatprep.mubr.msk.f32.mxu0 %vm1407_vm4, %v3076_v54 }
 0x1c8   : > { %v3081_v56 = vadd.f32 %v2460_v55, %v3060_v45  ;;  %v1051_v57 = vpop.f32.mrb[3].mxu1  ;;  %2534 = vmatmul.mubr.msk.f32.gmra.mrb[36].mxu0 %vm1407_vm4, %v3071_v52 }
 0x1c9   : > { %v3086_v58 = vadd.f32 %v3060_v45, %v1051_v57 }
 0x1cb   : > { %v2463_v59 = vpop.f32.mrb[4].mxu1  ;;  %2536 = vmatprep.mubr.msk.f32.mxu0 %vm1407_vm4, %v3086_v58 }
 0x1cc   : > { %v3091_v60 = vadd.f32 %v2463_v59, %v3060_v45  ;;  %v1061_v61 = vpop.f32.mrb[5].mxu1  ;;  %2537 = vmatmul.mubr.msk.f32.gmra.mrb[38].mxu0 %vm1407_vm4, %v3081_v56 }
 0x1cd   : > { %v3096_v62 = vadd.f32 %v3060_v45, %v1061_v61 }
 0x1cf   : > { %v2466_v63 = vpop.f32.mrb[6].mxu1  ;;  %2539 = vmatprep.mubr.msk.f32.mxu0 %vm1407_vm4, %v3096_v62 }
 0x1d0   : > { %v3101_v0 = vadd.f32 %v2466_v63, %v3060_v45  ;;  %v1071_v1 = vpop.f32.mrb[7].mxu1  ;;  %2540 = vmatmul.mubr.msk.f32.gmra.mrb[40].mxu0 %vm1407_vm4, %v3091_v60 }
 0x1d1   : > { %v3106_v2 = vadd.f32 %v3060_v45, %v1071_v1 }
 0x1d3   : > { %v2469_v3 = vpop.f32.mrb[8].mxu1  ;;  %2542 = vmatprep.mubr.msk.f32.mxu0 %vm1407_vm4, %v3106_v2 }
 0x1d4   : > { %v3111_v4 = vadd.f32 %v2469_v3, %v3060_v45  ;;  %v1081_v5 = vpop.f32.mrb[9].mxu1  ;;  %2543 = vmatmul.mubr.msk.f32.gmra.mrb[42].mxu0 %vm1407_vm4, %v3101_v0 }
 0x1d5   : > { %v3116_v6 = vadd.f32 %v3060_v45, %v1081_v5 }
 0x1d7   : > { %v2472_v7 = vpop.f32.mrb[10].mxu1  ;;  %2545 = vmatprep.mubr.msk.f32.mxu0 %vm1407_vm4, %v3116_v6 }
 0x1d8   : > { %v3121_v8 = vadd.f32 %v2472_v7, %v3060_v45  ;;  %v1091_v9 = vpop.f32.mrb[11].mxu1  ;;  %2546 = vmatmul.mubr.msk.f32.gmra.mrb[44].mxu0 %vm1407_vm4, %v3111_v4 }
 0x1d9   : > { %v3126_v10 = vadd.f32 %v3060_v45, %v1091_v9 }
 0x1db   : > { %v2475_v11 = vpop.f32.mrb[12].mxu1  ;;  %2548 = vmatprep.mubr.msk.f32.mxu0 %vm1407_vm4, %v3126_v10 }
 0x1dc   : > { %v3131_v12 = vadd.f32 %v2475_v11, %v3060_v45  ;;  %v1101_v13 = vpop.f32.mrb[13].mxu1  ;;  %2549 = vmatmul.mubr.msk.f32.gmra.mrb[46].mxu0 %vm1407_vm4, %v3121_v8 }
 0x1dd   : > { %v3136_v14 = vadd.f32 %v3060_v45, %v1101_v13 }
 0x1df   : > { %2551 = vmatprep.mubr.msk.f32.mxu0 %vm1407_vm4, %v3136_v14  ;;  %v3140_v15 = vpop.f32.mrb[14].mxu1 }
 0x1e0   : > { %2552 = vmatmul.mubr.msk.f32.gmra.mrb[48].mxu0 %vm1407_vm4, %v3131_v12  ;;  %v3144_v16 = vpop.f32.mrb[15].mxu1 }
 0x1e3   : > { %v3146_v17 = vpop.f32.mrb[16].mxu1 }
 0x1e4   : > { %v3148_v18 = vpop.f32.mrb[17].mxu1 }
 0x1e7   : > { %v3150_v19 = vpop.f32.mrb[18].mxu1 }
 0x1e8   : > { %v3152_v20 = vpop.f32.mrb[19].mxu1 }
 0x1eb   : > { %v3154_v21 = vpop.f32.mrb[20].mxu1 }
 0x1ec   : > { %v3156_v22 = vpop.f32.mrb[21].mxu1 }
 0x1ef   : > { %v3158_v23 = vpop.f32.mrb[22].mxu1 }
 0x1f0   : > { %v3160_v24 = vpop.f32.mrb[23].mxu1 }
 0x1f3   : > { %v3162_v25 = vpop.f32.mrb[24].mxu1 }
 0x1f4   : > { %v3164_v26 = vpop.f32.mrb[25].mxu1 }
 0x1f7   : > { %v3166_v27 = vpop.f32.mrb[26].mxu1 }
 0x1f8   : > { %v3168_v28 = vpop.f32.mrb[27].mxu1 }
 0x1fb   : > { %v3170_v29 = vpop.f32.mrb[28].mxu1 }
 0x1fc   : > { %v3172_v30 = vpop.f32.mrb[29].mxu1 }
 0x297   : > { %v2532_v32 = vpop.f32.mrb[34].mxu0 }
 0x298   : > { %v1609_v33 = vadd.f32 %v2532_v32, %v2195_v31  ;;  %v1522_v34 = vpop.f32.mrb[35].mxu0 }
 0x299   : > { %v1608_v35 = vadd.f32 %v2195_v31, %v1522_v34 }
 0x29a   : > { %v1625_v38 = vmax.f32 %v1609_v33, 0.0 }
 0x29b   : > { %v1624_v36 = vmax.f32 %v1608_v35, 0.0  ;;  %v2535_v37 = vpop.f32.mrb[36].mxu0 }
 0x29c   : > { %v1611_v39 = vadd.f32 %v2535_v37, %v2195_v31  ;;  %v1532_v40 = vpop.f32.mrb[37].mxu0 }
 0x29d   : > { %v1610_v51 = vadd.f32 %v2195_v31, %v1532_v40  ;;  %2562 = vmatprep.mubr.msk.f32.mxu1 %vm499_vm0, %v1624_v36 }
 0x29e   : > { %2563 = vmatmul.mubr.msk.f32.vlgmr.msra.gmra.mrb[30].mxu1 %vm499_vm0, %v1625_v38  ;;  %v1627_v43 = vmax.f32 %v1611_v39, 0.0 }
 0x29f   : > { %v1626_v41 = vmax.f32 %v1610_v51, 0.0  ;;  %v2538_v42 = vpop.f32.mrb[38].mxu0 }
 0x2a0   : > { %v1613_v44 = vadd.f32 %v2538_v42, %v2195_v31  ;;  %v1542_v46 = vpop.f32.mrb[39].mxu0 }
 0x2a1   : > { %v1612_v47 = vadd.f32 %v2195_v31, %v1542_v46  ;;  %2565 = vmatprep.mubr.msk.f32.mxu1 %vm499_vm0, %v1626_v41 }
 0x2a2   : > { %2566 = vmatmul.mubr.msk.f32.gmra.mrb[32].mxu1 %vm499_vm0, %v1627_v43  ;;  %v1629_v55 = vmax.f32 %v1613_v44, 0.0 }
 0x2a3   : > { %v1628_v50 = vmax.f32 %v1612_v47, 0.0  ;;  %v2541_v53 = vpop.f32.mrb[40].mxu0 }
 0x2a4   : > { %v1615_v57 = vadd.f32 %v2541_v53, %v2195_v31  ;;  %v1552_v59 = vpop.f32.mrb[41].mxu0 }
 0x2a5   : > { %v1614_v61 = vadd.f32 %v2195_v31, %v1552_v59  ;;  %2568 = vmatprep.mubr.msk.f32.mxu1 %vm499_vm0, %v1628_v50 }
 0x2a6   : > { %2569 = vmatmul.mubr.msk.f32.gmra.mrb[34].mxu1 %vm499_vm0, %v1629_v55  ;;  %v1631_v3 = vmax.f32 %v1615_v57, 0.0  ;;  %v2733_v55 = vmov 0.0|0.0   ;;  %v2735_v57 = vmov 0.0  }
 0x2a7   : > { %v1630_v63 = vmax.f32 %v1614_v61, 0.0  ;;  %v2544_v1 = vpop.f32.mrb[42].mxu0  ;;  %2657 = vmatprep.subr.bf16.mxu1 %v2733_v55 }
 0x2a8   : > { %v1617_v5 = vadd.f32 %v2544_v1, %v2195_v31  ;;  %v1562_v7 = vpop.f32.mrb[43].mxu0 }
 0x2a9   : > { %v1616_v9 = vadd.f32 %v2195_v31, %v1562_v7  ;;  %2571 = vmatprep.mubr.msk.f32.mxu1 %vm499_vm0, %v1630_v63  ;;  %v1112_v7 = vadd.f32 %v3060_v45, %v3144_v16 }
 0x2aa   : > { %2572 = vmatmul.mubr.msk.f32.gmra.mrb[36].mxu1 %vm499_vm0, %v1631_v3  ;;  %v1633_v32 = vmax.f32 %v1617_v5, 0.0  ;;  %v1117_v3 = vadd.f32 %v3140_v15, %v3060_v45 }
 0x2ab   : > { %v1632_v11 = vmax.f32 %v1616_v9, 0.0  ;;  %v2547_v13 = vpop.f32.mrb[44].mxu0 }
 0x2ac   : > { %v1619_v33 = vadd.f32 %v2547_v13, %v2195_v31  ;;  %v1572_v34 = vpop.f32.mrb[45].mxu0 }
 0x2ad   : > { %v1618_v35 = vadd.f32 %v2195_v31, %v1572_v34  ;;  %2574 = vmatprep.mubr.msk.f32.mxu1 %vm499_vm0, %v1632_v11 }
 0x2ae   : > { %2575 = vmatmul.mubr.msk.f32.gmra.mrb[38].mxu1 %vm499_vm0, %v1633_v32  ;;  %v1635_v38 = vmax.f32 %v1619_v33, 0.0 }
 0x2af   : > { %v1634_v36 = vmax.f32 %v1618_v35, 0.0  ;;  %v2550_v37 = vpop.f32.mrb[46].mxu0 }
 0x2b0   : > { %v1621_v39 = vadd.f32 %v2550_v37, %v2195_v31  ;;  %v1582_v40 = vpop.f32.mrb[47].mxu0 }
 0x2b1   : > { %v1620_v51 = vadd.f32 %v2195_v31, %v1582_v40  ;;  %2577 = vmatprep.mubr.msk.f32.mxu1 %vm499_vm0, %v1634_v36  ;;  %v1127_v36 = vadd.f32 %v3146_v17, %v3060_v45 }
 0x2b2   : > { %2578 = vmatmul.mubr.msk.f32.gmra.mrb[40].mxu1 %vm499_vm0, %v1635_v38  ;;  %v1637_v43 = vmax.f32 %v1621_v39, 0.0 }
 0x2b3   : > { %v1636_v41 = vmax.f32 %v1620_v51, 0.0  ;;  %v2553_v42 = vpop.f32.mrb[48].mxu0 }
 0x2b4   : > { %v1623_v44 = vadd.f32 %v2553_v42, %v2195_v31  ;;  %v1592_v46 = vpop.f32.mrb[49].mxu0 }
 0x2b5   : > { %v1622_v47 = vadd.f32 %v2195_v31, %v1592_v46  ;;  %2580 = vmatprep.mubr.msk.f32.mxu1 %vm499_vm0, %v1636_v41  ;;  %v3197_v31 = vld [vmem:[%s3312_s11] ss:$0 sm:$0xff] }
 0x2b6   : > { %2581 = vmatmul.mubr.msk.f32.gmra.mrb[42].mxu1 %vm499_vm0, %v1637_v43  ;;  %v1639_v53 = vmax.f32 %v1623_v44, 0.0  ;;  %v1132_v44 = vadd.f32 %v3060_v45, %v3152_v20  ;;  %v1147_v20 = vadd.f32 %v3154_v21, %v3060_v45  ;;  %v1157_v21 = vadd.f32 %v3158_v23, %v3060_v45 }
 0x2b7   : > { %v1638_v50 = vmax.f32 %v1622_v47, 0.0 }
 0x2b9   : > { %2583 = vmatprep.mubr.msk.f32.mxu1 %vm499_vm0, %v1638_v50 }
 0x2ba   : > { %2584 = vmatmul.mubr.msk.f32.gmra.mrb[44].mxu1 %vm499_vm0, %v1639_v53 }
 0x2bb   : > { %2618 = vmatprep.mubr.msk.f32.mxu1 %vm2734_vm5, %v2735_v57 }
 0x371   : > { %v2564_v59 = vpop.f32.mrb[30].mxu1 }
 0x372   : > { %v1771_v61 = vadd.f32 %v2564_v59, %v3197_v31  ;;  %v1765_v63 = vpop.f32.mrb[31].mxu1 }
 0x373   : > { %v1766_v1 = vadd.f32 %v3197_v31, %v1765_v63 }
 0x374   : > { %v1845_v5 = vadd.f32 %v1771_v61, %v3066_v49  ;;  %v1122_v49 = vadd.f32 %v3060_v45, %v3148_v18  ;;  %v1137_v18 = vadd.f32 %v3150_v19, %v3060_v45 }
 0x375   : > { %v1844_v9 = vadd.f32 %v1766_v1, %v3063_v48  ;;  %v2567_v11 = vpop.f32.mrb[32].mxu1  ;;  %v1142_v1 = vadd.f32 %v3060_v45, %v3156_v22  ;;  %v1152_v22 = vadd.f32 %v3060_v45, %v3160_v24  ;;  %v1167_v24 = vadd.f32 %v3162_v25, %v3060_v45 }
 0x376   : > { %v1861_v13 = vsub.f32 %v1845_v5, %v1117_v3  ;;  %v1781_v32 = vadd.f32 %v2567_v11, %v3197_v31  ;;  %v1775_v33 = vpop.f32.mrb[33].mxu1  ;;  %v1177_v25 = vadd.f32 %v3166_v27, %v3060_v45 }
 0x377   : > { %v1860_v34 = vsub.f32 %v1844_v9, %v1112_v7  ;;  %v1776_v35 = vadd.f32 %v3197_v31, %v1775_v33 }
 0x378   : > { %v1877_v37 = vmul.f32 %v1861_v13, %v1861_v13  ;;  %v1847_v15 = vadd.f32 %v1781_v32, %v3071_v52 }
 0x379   : > { %v1876_v16 = vmul.f32 %v1860_v34, %v1860_v34  ;;  %v1846_v48 = vadd.f32 %v1776_v35, %v3076_v54  ;;  %v2570_v38 = vpop.f32.mrb[34].mxu1 }
 0x37a   : > { %v1863_v39 = vsub.f32 %v1847_v15, %v1127_v36  ;;  %v1791_v40 = vadd.f32 %v2570_v38, %v3197_v31  ;;  %v1785_v51 = vpop.f32.mrb[35].mxu1 }
 0x37b   : > { %v2658_v17 = vpack.c.bf16 %v1877_v37, %v1876_v16  ;;  %v1862_v42 = vsub.f32 %v1846_v48, %v1122_v49  ;;  %v1786_v52 = vadd.f32 %v3197_v31, %v1785_v51 }
 0x37c   : > { %v1879_v43 = vmul.f32 %v1863_v39, %v1863_v39  ;;  %v1849_v54 = vadd.f32 %v1791_v40, %v3081_v56  ;;  %v1162_v39 = vadd.f32 %v3060_v45, %v3164_v26  ;;  %v1172_v26 = vadd.f32 %v3060_v45, %v3168_v28 }
 0x37d   : > { %v1878_v46 = vmul.f32 %v1862_v42, %v1862_v42  ;;  %v1848_v47 = vadd.f32 %v1786_v52, %v3086_v58  ;;  %v2573_v50 = vpop.f32.mrb[36].mxu1  ;;  %2660 = vmatpush3.bf16.xpose.msk.msra.mxu1 %vm3218_vm6, %v2658_v17  ;;  %v1187_v28 = vadd.f32 %v3170_v29, %v3060_v45 }
 0x37e   : > { %v1865_v53 = vsub.f32 %v1849_v54, %v1137_v18  ;;  %v1801_v57 = vadd.f32 %v2573_v50, %v3197_v31  ;;  %v1795_v59 = vpop.f32.mrb[37].mxu1  ;;  %2661 = vmatprep.subr.bf16.mxu1 %v2733_v55 }
 0x37f   : > { %v2662_v19 = vpack.c.bf16 %v1879_v43, %v1878_v46  ;;  %v1864_v61 = vsub.f32 %v1848_v47, %v1132_v44  ;;  %v1796_v56 = vadd.f32 %v3197_v31, %v1795_v59 }
 0x380   : > { %v1881_v63 = vmul.f32 %v1865_v53, %v1865_v53  ;;  %v1851_v58 = vadd.f32 %v1801_v57, %v3091_v60 }
 0x381   : > { %v1880_v3 = vmul.f32 %v1864_v61, %v1864_v61  ;;  %v1850_v5 = vadd.f32 %v1796_v56, %v3096_v62  ;;  %v2576_v7 = vpop.f32.mrb[38].mxu1  ;;  %v1182_v56 = vadd.f32 %v3060_v45, %v3172_v30  ;;  %v2736_v45 = vmov 1.0  }
 0x382   : > { %v1867_v9 = vsub.f32 %v1851_v58, %v1147_v20  ;;  %v1811_v11 = vadd.f32 %v2576_v7, %v3197_v31  ;;  %v1805_v13 = vpop.f32.mrb[39].mxu1 }
 0x383   : > { %v2666_v32 = vpack.c.bf16 %v1881_v63, %v1880_v3  ;;  %v1866_v33 = vsub.f32 %v1850_v5, %v1142_v1  ;;  %v1806_v34 = vadd.f32 %v3197_v31, %v1805_v13 }
 0x384   : > { %v1883_v35 = vmul.f32 %v1867_v9, %v1867_v9  ;;  %v1853_v60 = vadd.f32 %v1811_v11, %v3101_v0 }
 0x385   : > { %v1882_v36 = vmul.f32 %v1866_v33, %v1866_v33  ;;  %v1852_v62 = vadd.f32 %v1806_v34, %v3106_v2  ;;  %v2579_v37 = vpop.f32.mrb[40].mxu1  ;;  %2664 = vmatpush3.bf16.xpose.msk.msra.mxu1 %vm3218_vm6, %v2662_v19 }
 0x386   : > { %v1869_v15 = vsub.f32 %v1853_v60, %v1157_v21  ;;  %v1821_v49 = vadd.f32 %v2579_v37, %v3197_v31  ;;  %v1815_v16 = vpop.f32.mrb[41].mxu1  ;;  %2665 = vmatprep.subr.bf16.mxu1 %v2733_v55 }
 0x387   : > { %v2670_v23 = vpack.c.bf16 %v1883_v35, %v1882_v36  ;;  %v1868_v48 = vsub.f32 %v1852_v62, %v1152_v22  ;;  %v1816_v0 = vadd.f32 %v3197_v31, %v1815_v16 }
 0x388   : > { %v1885_v38 = vmul.f32 %v1869_v15, %v1869_v15  ;;  %v1855_v2 = vadd.f32 %v1821_v49, %v3111_v4 }
 0x389   : > { %v1884_v40 = vmul.f32 %v1868_v48, %v1868_v48  ;;  %v1854_v51 = vadd.f32 %v1816_v0, %v3116_v6  ;;  %v2582_v17 = vpop.f32.mrb[42].mxu1 }
 0x38a   : > { %v1871_v42 = vsub.f32 %v1855_v2, %v1167_v24  ;;  %v1831_v52 = vadd.f32 %v2582_v17, %v3197_v31  ;;  %v1825_v18 = vpop.f32.mrb[43].mxu1 }
 0x38b   : > { %v2674_v43 = vpack.c.bf16 %v1885_v38, %v1884_v40  ;;  %v1870_v54 = vsub.f32 %v1854_v51, %v1162_v39  ;;  %v1826_v44 = vadd.f32 %v3197_v31, %v1825_v18 }
 0x38c   : > { %v1887_v46 = vmul.f32 %v1871_v42, %v1871_v42  ;;  %v1857_v4 = vadd.f32 %v1831_v52, %v3121_v8 }
 0x38d   : > { %v1886_v47 = vmul.f32 %v1870_v54, %v1870_v54  ;;  %v1856_v6 = vadd.f32 %v1826_v44, %v3126_v10  ;;  %v2585_v50 = vpop.f32.mrb[44].mxu1  ;;  %2668 = vmatpush3.bf16.xpose.msk.msra.mxu1 %vm3218_vm6, %v2666_v32 }
 0x38e   : > { %v1873_v53 = vsub.f32 %v1857_v4, %v1177_v25  ;;  %v1841_v57 = vadd.f32 %v2585_v50, %v3197_v31  ;;  %v1835_v59 = vpop.f32.mrb[45].mxu1  ;;  %2669 = vmatprep.subr.bf16.mxu1 %v2733_v55 }
 0x38f   : > { %v2678_v27 = vpack.c.bf16 %v1887_v46, %v1886_v47  ;;  %v1872_v19 = vsub.f32 %v1856_v6, %v1172_v26  ;;  %v1836_v8 = vadd.f32 %v3197_v31, %v1835_v59 }
 0x390   : > { %v1889_v61 = vmul.f32 %v1873_v53, %v1873_v53  ;;  %v1859_v10 = vadd.f32 %v1841_v57, %v3131_v12 }
 0x391   : > { %v1888_v20 = vmul.f32 %v1872_v19, %v1872_v19  ;;  %v1858_v63 = vadd.f32 %v1836_v8, %v3136_v14 }
 0x392   : > { %v1875_v58 = vsub.f32 %v1859_v10, %v1187_v28 }
 0x393   : > { %v2682_v1 = vpack.c.bf16 %v1889_v61, %v1888_v20  ;;  %v1874_v3 = vsub.f32 %v1858_v63, %v1182_v56 }
 0x394   : > { %v1891_v5 = vmul.f32 %v1875_v58, %v1875_v58 }
 0x395   : > { %v1890_v7 = vmul.f32 %v1874_v3, %v1874_v3  ;;  %2672 = vmatpush3.bf16.xpose.msk.msra.mxu1 %vm3218_vm6, %v2670_v23 }
 0x396   : > { %2673 = vmatprep.subr.bf16.mxu1 %v2733_v55 }
 0x397   : > { %v2686_v29 = vpack.c.bf16 %v1891_v5, %v1890_v7 }
 0x39d   : > { %2676 = vmatpush3.bf16.xpose.msk.msra.mxu1 %vm3218_vm6, %v2674_v43 }
 0x39e   : > { %2677 = vmatprep.subr.bf16.mxu1 %v2733_v55 }
 0x3a5   : > { %2680 = vmatpush3.bf16.xpose.msk.msra.mxu1 %vm3218_vm6, %v2678_v27 }
 0x3a6   : > { %2681 = vmatprep.subr.bf16.mxu1 %v2733_v55 }
 0x3ad   : > { %2684 = vmatpush3.bf16.xpose.msk.msra.mxu1 %vm3218_vm6, %v2682_v1 }
 0x3ae   : > { %2685 = vmatprep.subr.bf16.mxu1 %v2733_v55 }
 0x3b5   : > { %2688 = vmatpush3.bf16.xpose.msk.msra.mxu1 %vm3218_vm6, %v2686_v29 }
 0x3bc   : > { %2619 = vmatmul.mubr.msk.f32.vlgmr.msra.gmra.mrb[46].mxu1 %vm1407_vm4, %v2736_v45 }
 0x48f   : > { %v2009_v12 = vpop.f32.mrb[46].mxu1 }
 0x490   : > { %2013 = vst [vmem:[%s455_s24] sm:$0x1] %v2009_v12  ;;  %v2620_v14 = vpop.f32.mrb[47].mxu1 }
 0x491 PF: > { %s22_s21 = sadd.s32 1, %s2731_s21  }
 0x492   : > { %p19_p5 = scmp.ge.s32.totalorder %s22_s21, 4  }
 0x494   :  { %21 = sbr.rel (!%p19_p5) target bundleno = 1 (0x1), region = 104 }

</bundles_post_ra>
